<compile_context>
chip_gen: v7x
topology: tpu7x:2x2x1
jax: 0.10.0
libtpu: 0.0.40
codegen_flags: <defaults>
</compile_context>

<pallas_src>
import functools

import jax
import jax.numpy as jnp
from jax import lax
from jax.experimental import pallas as pl
from jax.experimental.pallas import tpu as pltpu

LANE = 128       # vreg lane width
SUBLANE = 8      # vreg sublane count
TN_MAX = 1024    # max lane-dim tile (multiple of 128)
TM_MAX = 512     # max sublane-dim tile (multiple of 8) -> 2 MiB f32 per input tile


def _round_up(v, m):
    return ((v + m - 1) // m) * m


def _int_power(q, p: int):
    """Exponentiation by repeated multiplication (VPU) for small integer p."""
    if p == 0:
        return jnp.ones_like(q)
    result = None
    base = q
    while p:
        if p & 1:
            result = base if result is None else result * base
        p >>= 1
        if p:
            base = base * base
    return result


def _focal_loss_kernel(x_ref, t_ref, out_ref, *, alpha, gamma, rem, tm, tn):
    x = x_ref[...].astype(jnp.float32)
    t = t_ref[...].astype(jnp.float32)

    # Numerically-stable BCE with logits (matches PyTorch):
    #   bce = max(x, 0) - x*t + log(1 + exp(-|x|))
    bce = jnp.maximum(x, 0.0) - x * t + jnp.log1p(jnp.exp(-jnp.abs(x)))
    pt = jnp.exp(-bce)
    q = 1.0 - pt

    g = float(gamma)
    if g.is_integer() and 0 <= int(g) <= 8:
        w = _int_power(q, int(g))          # pure VPU multiplies
    else:
        w = jnp.power(q, g)                # EUP fallback for non-integer gamma

    focal = (alpha * w) * bce

    if rem >= tm * tn:
        # Element count divides the tiling exactly: no masking anywhere.
        out_ref[0, 0] = jnp.sum(focal)
    else:
        i = pl.program_id(0)
        last = pl.num_programs(0) - 1

        # All blocks except the last are fully valid: plain reduce, no mask.
        @pl.when(i < last)
        def _():
            out_ref[0, 0] = jnp.sum(focal)

        # Only the last block contains padding: mask via block-local iota
        # against the (static) number of valid elements in this block.
        @pl.when(i == last)
        def _():
            rows = lax.broadcasted_iota(jnp.int32, (tm, tn), 0)
            cols = lax.broadcasted_iota(jnp.int32, (tm, tn), 1)
            flat = rows * tn + cols        # block-local index: fits int32
            out_ref[0, 0] = jnp.sum(jnp.where(flat < rem, focal, 0.0))


def focal_loss(inputs, targets, alpha=0.5, gamma=2.0):
    """Returns scalar focal loss, mean-reduced over all elements."""
    assert inputs.shape == targets.shape
    n = int(inputs.size)
    assert n > 0

    x = inputs.reshape(-1)
    t = targets.reshape(-1)

    # Lane-dense layout: last dim TN (<=1024, multiple of 128).
    tn = min(TN_MAX, _round_up(n, LANE))
    rows = pl.cdiv(n, tn)
    rp = _round_up(rows, SUBLANE)

    # Balanced sublane tiling: at most TM_MAX rows per block, at least 2 blocks
    # when there is enough work (megacore on v7x), minimal extra padding.
    nb_target = max(pl.cdiv(rp, TM_MAX), 2 if rp >= 2 * SUBLANE else 1)
    tm = _round_up(pl.cdiv(rp, nb_target), SUBLANE)
    padded_rows = _round_up(rows, tm)
    num_blocks = padded_rows // tm
    total = padded_rows * tn

    pad = total - n
    if pad:  # pad only when actually needed (single XLA copy, zeros are masked)
        x = jnp.pad(x, (0, pad))
        t = jnp.pad(t, (0, pad))
    x = x.reshape(padded_rows, tn)
    t = t.reshape(padded_rows, tn)

    # Valid elements in the last block (all padding is confined to that block,
    # since pad < tm*tn by construction).
    rem = n - (num_blocks - 1) * tm * tn

    kernel = functools.partial(
        _focal_loss_kernel,
        alpha=float(alpha), gamma=float(gamma), rem=rem, tm=tm, tn=tn,
    )

    bytes_in = x.size * x.dtype.itemsize + t.size * t.dtype.itemsize

    partials = pl.pallas_call(
        kernel,
        out_shape=jax.ShapeDtypeStruct((num_blocks, 1), jnp.float32),
        grid_spec=pltpu.PrefetchScalarGridSpec(
            num_scalar_prefetch=0,
            grid=(num_blocks,),
            in_specs=[
                pl.BlockSpec((tm, tn), lambda i: (i, 0)),
                pl.BlockSpec((tm, tn), lambda i: (i, 0)),
            ],
            out_specs=pl.BlockSpec(
                (1, 1), lambda i: (i, 0), memory_space=pltpu.SMEM
            ),
        ),
        compiler_params=pltpu.CompilerParams(
            # Per-block partial sums are independent -> megacore-shardable
            # across both TensorCores on v7x; harmless on v5e/v6e.
            dimension_semantics=("parallel",),
        ),
        cost_estimate=pl.CostEstimate(
            flops=10 * total,
            transcendentals=3 * total,
            bytes_accessed=bytes_in + num_blocks * 4,
        ),
    )(x, t)

    return jnp.sum(partials) / jnp.float32(n)


def focal_loss_ref(inputs, targets, alpha=0.5, gamma=2.0):
    x = inputs.astype(jnp.float32)
    t = targets.astype(jnp.float32)
    bce = jnp.maximum(x, 0.0) - x * t + jnp.log1p(jnp.exp(-jnp.abs(x)))
    pt = jnp.exp(-bce)
    return jnp.mean(alpha * (1.0 - pt) ** gamma * bce)


if __name__ == "__main__":
    key = jax.random.PRNGKey(0)
    k1, k2 = jax.random.split(key)

    # Small NCHW-like shapes (logits + binary targets).
    inputs = jax.random.normal(k1, (2, 4, 16, 16), dtype=jnp.float32)
    targets = jax.random.bernoulli(k2, 0.5, (2, 4, 16, 16)).astype(jnp.float32)

    out = focal_loss(inputs, targets, alpha=0.5, gamma=2.0)
    out = jax.block_until_ready(out)

    ref = focal_loss_ref(inputs, targets, alpha=0.5, gamma=2.0)
    assert jnp.allclose(out, ref, rtol=1e-5, atol=1e-6), (out, ref)

    print("KERNEL_OK")
</pallas_src>

<mosaic_0001>
module attributes {stable_mosaic.version = 11 : i64} {
  func.func @_focal_loss_kernel(%arg0: i32, %arg1: memref<8x1024xf32, #tpu.memory_space<vmem>>, %arg2: memref<8x1024xf32, #tpu.memory_space<vmem>>, %arg3: memref<1x1xf32, #tpu.memory_space<smem>>) attributes {dimension_semantics = [#tpu.dimension_semantics<parallel>], iteration_bounds = array<i64: 1>, scalar_prefetch = 0 : i64, scratch_operands = 0 : i64, tpu.core_type = #tpu.core_type<tc>, window_params = [{transform_indices = @transform_0, window_bounds = array<i64: 8, 1024>}, {transform_indices = @transform_1, window_bounds = array<i64: 8, 1024>}, {transform_indices = @transform_2, window_bounds = array<i64: 1, 1>}]} {
    %c0 = arith.constant 0 : index
    %c0_0 = arith.constant 0 : index
    %0 = vector.load %arg1[%c0, %c0_0] : memref<8x1024xf32, #tpu.memory_space<vmem>>, vector<8x1024xf32>
    %c0_1 = arith.constant 0 : index
    %c0_2 = arith.constant 0 : index
    %1 = vector.load %arg2[%c0_1, %c0_2] : memref<8x1024xf32, #tpu.memory_space<vmem>>, vector<8x1024xf32>
    %cst = arith.constant 0.000000e+00 : f32
    %2 = vector.broadcast %cst : f32 to vector<8x1024xf32>
    %3 = arith.maximumf %0, %2 : vector<8x1024xf32>
    %4 = arith.mulf %0, %1 : vector<8x1024xf32>
    %5 = arith.subf %3, %4 : vector<8x1024xf32>
    %6 = math.absf %0 : vector<8x1024xf32>
    %cst_3 = arith.constant 0.000000e+00 : f32
    %7 = vector.broadcast %cst_3 : f32 to vector<8x1024xf32>
    %8 = arith.subf %7, %6 : vector<8x1024xf32>
    %9 = math.exp %8 : vector<8x1024xf32>
    %10 = math.log1p %9 : vector<8x1024xf32>
    %11 = arith.addf %5, %10 : vector<8x1024xf32>
    %cst_4 = arith.constant 0.000000e+00 : f32
    %12 = vector.broadcast %cst_4 : f32 to vector<8x1024xf32>
    %13 = arith.subf %12, %11 : vector<8x1024xf32>
    %14 = math.exp %13 : vector<8x1024xf32>
    %cst_5 = arith.constant 1.000000e+00 : f32
    %15 = vector.broadcast %cst_5 : f32 to vector<8x1024xf32>
    %16 = arith.subf %15, %14 : vector<8x1024xf32>
    %17 = arith.mulf %16, %16 : vector<8x1024xf32>
    %cst_6 = arith.constant 5.000000e-01 : f32
    %18 = vector.broadcast %cst_6 : f32 to vector<8x1024xf32>
    %19 = arith.mulf %18, %17 : vector<8x1024xf32>
    %20 = arith.mulf %19, %11 : vector<8x1024xf32>
    %c0_i32 = arith.constant 0 : i32
    %21 = arith.cmpi slt, %arg0, %c0_i32 : i32
    %22 = arith.extui %21 : i1 to i32
    %c0_i32_7 = arith.constant 0 : i32
    %23 = arith.cmpi ne, %22, %c0_i32_7 : i32
    scf.if %23 {
      %27 = vector.shape_cast %20 : vector<8x1024xf32> to vector<1x8x1024xf32>
      %cst_10 = arith.constant dense<0.000000e+00> : vector<1xf32>
      %28 = vector.multi_reduction <add>, %27, %cst_10 [1, 2] : vector<1x8x1024xf32> to vector<1xf32>
      %29 = vector.shape_cast %28 : vector<1xf32> to vector<1x1x1xf32>
      %30 = vector.extract %29[0, 0, 0] : f32 from vector<1x1x1xf32>
      %c0_11 = arith.constant 0 : index
      %c0_12 = arith.constant 0 : index
      %31 = memref.load %arg3[%c0_11, %c0_12] : memref<1x1xf32, #tpu.memory_space<smem>>
      memref.store %30, %arg3[%c0_11, %c0_12] : memref<1x1xf32, #tpu.memory_space<smem>>
    } else {
    }
    %c0_i32_8 = arith.constant 0 : i32
    %24 = arith.cmpi eq, %arg0, %c0_i32_8 : i32
    %25 = arith.extui %24 : i1 to i32
    %c0_i32_9 = arith.constant 0 : i32
    %26 = arith.cmpi ne, %25, %c0_i32_9 : i32
    scf.if %26 {
      %27 = tpu.iota {dimensions = array<i32: 0>} : vector<8x1024xi32>
      %28 = tpu.iota {dimensions = array<i32: 1>} : vector<8x1024xi32>
      %c1024_i32 = arith.constant 1024 : i32
      %29 = vector.broadcast %c1024_i32 : i32 to vector<8x1024xi32>
      %30 = arith.muli %27, %29 : vector<8x1024xi32>
      %31 = arith.addi %30, %28 : vector<8x1024xi32>
      %c2048_i32 = arith.constant 2048 : i32
      %32 = vector.broadcast %c2048_i32 : i32 to vector<8x1024xi32>
      %33 = arith.cmpi slt, %31, %32 : vector<8x1024xi32>
      %cst_10 = arith.constant 0.000000e+00 : f32
      %34 = vector.broadcast %cst_10 : f32 to vector<8x1024xf32>
      %35 = arith.select %33, %20, %34 : vector<8x1024xi1>, vector<8x1024xf32>
      %36 = vector.shape_cast %35 : vector<8x1024xf32> to vector<1x8x1024xf32>
      %cst_11 = arith.constant dense<0.000000e+00> : vector<1xf32>
      %37 = vector.multi_reduction <add>, %36, %cst_11 [1, 2] : vector<1x8x1024xf32> to vector<1xf32>
      %38 = vector.shape_cast %37 : vector<1xf32> to vector<1x1x1xf32>
      %39 = vector.extract %38[0, 0, 0] : f32 from vector<1x1x1xf32>
      %c0_12 = arith.constant 0 : index
      %c0_13 = arith.constant 0 : index
      %40 = memref.load %arg3[%c0_12, %c0_13] : memref<1x1xf32, #tpu.memory_space<smem>>
      memref.store %39, %arg3[%c0_12, %c0_13] : memref<1x1xf32, #tpu.memory_space<smem>>
    } else {
    }
    return
  }
  func.func @transform_0(%arg0: i32) -> (i32, i32) {
    %c0_i32 = arith.constant 0 : i32
    %c0_i32_0 = arith.constant 0 : i32
    return %arg0, %c0_i32 : i32, i32
  }
  func.func @transform_1(%arg0: i32) -> (i32, i32) {
    %c0_i32 = arith.constant 0 : i32
    %c0_i32_0 = arith.constant 0 : i32
    return %arg0, %c0_i32 : i32, i32
  }
  func.func @transform_2(%arg0: i32) -> (i32, i32) {
    %c0_i32 = arith.constant 0 : i32
    %c0_i32_0 = arith.constant 0 : i32
    return %arg0, %c0_i32 : i32, i32
  }
}

</mosaic_0001>

<bundles_post_ra>
// kernel: tpu_custom_call.1
= control target key start
LH: loop header
LB: loop body
LE: loop exit
PB: predicated region body
PF: predicated region fallthrough
CT: control target
= control target key end

     0   :  { %7 = vsyncpa [#allocation3], 0  ;;  %s661_s0 = inlined_call_operand.hbm [shape: f32[8,1024], index: 0, kind: input, shape index: {}]   ;;  %s662_s1 = inlined_call_operand.hbm [shape: f32[8,1024], index: 1, kind: input, shape index: {}]   ;;  %s663_s2 = inlined_call_operand.hbm [shape: f32[1,1], index: 2, kind: output, shape index: {}]  }
   0x1   :  { %8 = vsyncpa [#allocation6], 0 }
   0x2   :  { %9 = vsyncpa [#allocation4], 0  ;;  %s452_s9 = smov [#allocation2]   ;;  %s453_s11 = smov [#allocation5]  }
   0x3   :  { %s16_s10 = sshll.u32 %s452_s9, 4  ;;  %s26_s12 = sshll.u32 %s453_s11, 4  ;;  %s17_s10 = int_to_ptr.vmem [resolvable:$true] %s16_s10  ;;  %s27_s12 = int_to_ptr.vmem [resolvable:$true] %s26_s12 }
   0x4   :  { %s392_s15 = scalar_lea.hbm %s661_s0, 1024 }
   0x5   :  { %p393_p0 = scmp.ne.s32.totalorder %s661_s0, %s392_s15  ;;  %p396_p1 = scmp.lt.u32.totalorder %s392_s15, %s661_s0 }
   0x7   :  { %p398_p2 = pnand %p396_p1, %p393_p0 }
   0x9   :  { %401 = shalt.err (!%p398_p2)
}
   0xa   :  { %s402_s20 = scalar_lea.vmem %s17_s10, 1024  ;;  %p407_p4 = scmp.lt.s32.totalorder %s17_s10, %s17_s10 }
   0xb   :  { %p403_p3 = scmp.ne.s32.totalorder %s17_s10, %s402_s20  ;;  %p408_p5 = scmp.lt.s32.totalorder %s402_s20, %s402_s20 }
   0xd   :  { %p409_p6 = por %p408_p5, %p407_p4 }
   0xf   :  { %p410_p7 = pnand %p409_p6, %p403_p3 }
  0x11   :  { %413 = shalt.err (!%p410_p7)
}
  0x12   :  { %19 = dma.hbm_to_vmem [thread:$0]  %s661_s0, 1024, %s17_s10, [#allocation3]  }
  0x13   :  { %s414_s25 = scalar_lea.hbm %s662_s1, 1024 }
  0x14   :  { %p415_p8 = scmp.ne.s32.totalorder %s662_s1, %s414_s25  ;;  %p418_p9 = scmp.lt.u32.totalorder %s414_s25, %s662_s1 }
  0x16   :  { %p420_p10 = pnand %p418_p9, %p415_p8 }
  0x18   :  { %423 = shalt.err (!%p420_p10)
}
  0x19   :  { %s424_s30 = scalar_lea.vmem %s27_s12, 1024  ;;  %p429_p12 = scmp.lt.s32.totalorder %s27_s12, %s27_s12 }
  0x1a   :  { %p425_p11 = scmp.ne.s32.totalorder %s27_s12, %s424_s30  ;;  %p430_p13 = scmp.lt.s32.totalorder %s424_s30, %s424_s30 }
  0x1c   :  { %p431_p0 = por %p430_p13, %p429_p12 }
  0x1e   :  { %p432_p1 = pnand %p431_p0, %p425_p11 }
  0x20   :  { %435 = shalt.err (!%p432_p1)
}
  0x21   :  { %29 = dma.hbm_to_vmem [thread:$0]  %s662_s1, 1024, %s27_s12, [#allocation6]  }
  0x22   :  { %446 = dma.done.wait [#allocation3], 1024  }
  0x23   :  { %447 = vsyncadd [#allocation3], 4294966272 }
  0x24   :  { %448 = dma.done.wait [#allocation6], 1024  }
  0x25   :  { %449 = vsyncadd [#allocation6], 4294966272  ;;  %v494_v0 = vld [vmem:[#allocation2] sm:$0xff]  ;;  %v496_v1 = vld [vmem:[#allocation2 + $0x8] sm:$0xff]  ;;  %v270_v35 = vlaneseq  ;;  %s436_s6 = scalar_lea.hbm %s663_s2, 16 }
  0x26   :  { %v498_v2 = vld [vmem:[#allocation2 + $0x10] sm:$0xff]  ;;  %v500_v3 = vld [vmem:[#allocation2 + $0x18] sm:$0xff]  ;;  %v502_v4 = vld [vmem:[#allocation2 + $0x20] sm:$0xff]  ;;  %v76_v7 = vand.u32 2147483647, %v494_v0  ;;  %v52_v39 = vmax.f32 %v494_v0, 0.0  ;;  %p437_p2 = scmp.ne.s32.totalorder %s663_s2, %s436_s6  ;;  %p440_p3 = scmp.lt.u32.totalorder %s436_s6, %s663_s2 }
  0x27   :  { %v504_v5 = vld [vmem:[#allocation2 + $0x28] sm:$0xff]  ;;  %v506_v6 = vld [vmem:[#allocation2 + $0x30] sm:$0xff]  ;;  %v509_v8 = vld [vmem:[#allocation2 + $0x38] sm:$0xff]  ;;  %v77_v9 = vand.u32 2147483647, %v496_v1  ;;  %v53_v40 = vmax.f32 %v496_v1, 0.0 }
  0x28   :  { %v78_v10 = vand.u32 2147483647, %v498_v2  ;;  %v79_v11 = vand.u32 2147483647, %v500_v3  ;;  %v80_v12 = vand.u32 2147483647, %v502_v4  ;;  %p442_p4 = pnand %p440_p3, %p437_p2 }
  0x29   :  { %v81_v13 = vand.u32 2147483647, %v504_v5  ;;  %v82_v14 = vand.u32 2147483647, %v506_v6  ;;  %v84_v15 = vsub.f32 0.0, %v76_v7  ;;  %v85_v16 = vsub.f32 0.0, %v77_v9 }
  0x2a   :  { %v86_v17 = vsub.f32 0.0, %v78_v10  ;;  %v87_v18 = vsub.f32 0.0, %v79_v11  ;;  %v83_v19 = vand.u32 2147483647, %v509_v8  ;;  %v88_v20 = vsub.f32 0.0, %v80_v12  ;;  %v44_v31 = vld [vmem:[#allocation5] sm:$0xff] }
  0x2b   :  { %v89_v21 = vsub.f32 0.0, %v81_v13  ;;  %v92_v22 = vmul.f32 1.442695, %v84_v15  ;;  %v94_v23 = vmul.f32 1.442695, %v85_v16  ;;  %v90_v25 = vsub.f32 0.0, %v82_v14 }
  0x2c   :  { %v96_v24 = vmul.f32 1.442695, %v86_v17  ;;  %v98_v26 = vmul.f32 1.442695, %v87_v18  ;;  %v100_v27 = vmul.f32 1.442695, %v88_v20  ;;  %v60_v42 = vmul.f32 %v44_v31, %v494_v0 }
  0x2d   :  { %344 = vpow2.f32 %v92_v22  ;;  %v91_v28 = vsub.f32 0.0, %v83_v19  ;;  %v102_v29 = vmul.f32 1.442695, %v89_v21  ;;  %v104_v30 = vmul.f32 1.442695, %v90_v25  ;;  %v45_v33 = vld [vmem:[#allocation5 + $0x8] sm:$0xff] }
  0x2e   :  { %346 = vpow2.f32 %v94_v23  ;;  %v46_v34 = vld [vmem:[#allocation5 + $0x10] sm:$0xff]  ;;  %v47_v36 = vld [vmem:[#allocation5 + $0x18] sm:$0xff]  ;;  %v48_v37 = vld [vmem:[#allocation5 + $0x20] sm:$0xff]  ;;  %v54_v41 = vmax.f32 %v498_v2, 0.0  ;;  %v55_v44 = vmax.f32 %v500_v3, 0.0  ;;  %v56_v45 = vmax.f32 %v502_v4, 0.0 }
  0x2f   :  { %348 = vpow2.f32 %v96_v24  ;;  %v106_v32 = vmul.f32 1.442695, %v91_v28  ;;  %v49_v38 = vld [vmem:[#allocation5 + $0x28] sm:$0xff]  ;;  %v50_v43 = vld [vmem:[#allocation5 + $0x30] sm:$0xff]  ;;  %v61_v46 = vmul.f32 %v45_v33, %v496_v1  ;;  %v51_v48 = vld [vmem:[#allocation5 + $0x38] sm:$0xff]  ;;  %v57_v49 = vmax.f32 %v504_v5, 0.0 }
  0x30   :  { %350 = vpow2.f32 %v98_v26  ;;  %v58_v50 = vmax.f32 %v506_v6, 0.0  ;;  %v59_v51 = vmax.f32 %v509_v8, 0.0  ;;  %v62_v52 = vmul.f32 %v46_v34, %v498_v2 }
  0x31   :  { %352 = vpow2.f32 %v100_v27  ;;  %v63_v54 = vmul.f32 %v47_v36, %v500_v3  ;;  %v64_v55 = vmul.f32 %v48_v37, %v502_v4  ;;  %v65_v56 = vmul.f32 %v49_v38, %v504_v5 }
  0x32   :  { %354 = vpow2.f32 %v102_v29  ;;  %v66_v59 = vmul.f32 %v50_v43, %v506_v6  ;;  %v533_v60 = vsub.f32 %v52_v39, %v60_v42  ;;  %v67_v0 = vmul.f32 %v51_v48, %v509_v8 }
  0x33   :  { %356 = vpow2.f32 %v104_v30  ;;  %v536_v1 = vsub.f32 %v53_v40, %v61_v46  ;;  %v538_v7 = vsub.f32 %v54_v41, %v62_v52  ;;  %v540_v9 = vsub.f32 %v55_v44, %v63_v54 }
  0x34   :  { %358 = vpow2.f32 %v106_v32  ;;  %v542_v12 = vsub.f32 %v56_v45, %v64_v55  ;;  %v544_v13 = vsub.f32 %v57_v49, %v65_v56  ;;  %v548_v16 = vsub.f32 %v58_v50, %v66_v59 }
  0x35   :  { %v550_v19 = vsub.f32 %v59_v51, %v67_v0 }
  0x37   :  { %v345_v47 = vpop.eup %344 }
  0x38   :  { %v347_v53 = vpop.eup %346  ;;  %v108_v57 = vadd.f32 1.0, %v345_v47  ;;  %v111_v61 = vmul.f32 -0.5, %v345_v47  ;;  %v114_v4 = vand.u32 2147483647, %v345_v47 }
  0x39   :  { %v349_v58 = vpop.eup %348  ;;  %v117_v62 = vadd.f32 1.0, %v347_v53  ;;  %v120_v5 = vmul.f32 -0.5, %v347_v53  ;;  %v123_v14 = vand.u32 2147483647, %v347_v53 }
  0x3a   :  { %v351_v63 = vpop.eup %350  ;;  %360 = vlog2.f32 %v108_v57  ;;  %v126_v2 = vadd.f32 1.0, %v349_v58  ;;  %v129_v6 = vmul.f32 -0.5, %v349_v58  ;;  %v112_v8 = vadd.f32 1.0, %v111_v61 }
  0x3b   :  { %v353_v3 = vpop.eup %352  ;;  %362 = vlog2.f32 %v117_v62  ;;  %v135_v10 = vadd.f32 1.0, %v351_v63  ;;  %v138_v17 = vmul.f32 -0.5, %v351_v63  ;;  %vm552_vm0 = vcmp.lt.f32.partialorder %v114_v4, 0.0004427343 }
  0x3c   :  { %364 = vlog2.f32 %v126_v2  ;;  %v355_v11 = vpop.eup %354  ;;  %v144_v18 = vadd.f32 1.0, %v353_v3  ;;  %v121_v21 = vadd.f32 1.0, %v120_v5  ;;  %v147_v22 = vmul.f32 -0.5, %v353_v3 }
  0x3d   :  { %v546_v15 = vpop.eup %356  ;;  %366 = vlog2.f32 %v135_v10  ;;  %v130_v24 = vadd.f32 1.0, %v129_v6  ;;  %v132_v25 = vand.u32 2147483647, %v349_v58  ;;  %v153_v26 = vadd.f32 1.0, %v355_v11 }
  0x3e   :  { %v556_v23 = vpop.eup %358  ;;  %368 = vlog2.f32 %v144_v18  ;;  %v113_v27 = vmul.f32 %v345_v47, %v112_v8  ;;  %vm558_vm1 = vcmp.lt.f32.partialorder %v123_v14, 0.0004427343  ;;  %v141_v29 = vand.u32 2147483647, %v351_v63 }
  0x3f   :  { %v162_v30 = vadd.f32 1.0, %v546_v15  ;;  %v139_v31 = vadd.f32 1.0, %v138_v17  ;;  %v150_v32 = vand.u32 2147483647, %v353_v3  ;;  %370 = vlog2.f32 %v153_v26 }
  0x40   :  { %v156_v33 = vmul.f32 -0.5, %v355_v11  ;;  %v122_v34 = vmul.f32 %v347_v53, %v121_v21  ;;  %v148_v36 = vadd.f32 1.0, %v147_v22  ;;  %v171_v37 = vadd.f32 1.0, %v556_v23 }
  0x41   :  { %372 = vlog2.f32 %v162_v30  ;;  %v131_v39 = vmul.f32 %v349_v58, %v130_v24  ;;  %vm564_vm2 = vcmp.lt.f32.partialorder %v132_v25, 0.0004427343  ;;  %v159_v41 = vand.u32 2147483647, %v355_v11 }
  0x42   :  { %v165_v42 = vmul.f32 -0.5, %v546_v15  ;;  %vm569_vm3 = vcmp.lt.f32.partialorder %v141_v29, 0.0004427343  ;;  %374 = vlog2.f32 %v171_v37  ;;  %v174_v46 = vmul.f32 -0.5, %v556_v23 }
  0x43   :  { %v140_v49 = vmul.f32 %v351_v63, %v139_v31  ;;  %vm574_vm4 = vcmp.lt.f32.partialorder %v150_v32, 0.0004427343  ;;  %v157_v51 = vadd.f32 1.0, %v156_v33  ;;  %v149_v54 = vmul.f32 %v353_v3, %v148_v36 }
  0x44   :  { %v361_v38 = vpop.eup %360  ;;  %v168_v55 = vand.u32 2147483647, %v546_v15  ;;  %vm583_vm5 = vcmp.lt.f32.partialorder %v159_v41, 0.0004427343  ;;  %v166_v59 = vadd.f32 1.0, %v165_v42  ;;  %v175_v0 = vadd.f32 1.0, %v174_v46 }
  0x45   :  { %v363_v43 = vpop.eup %362  ;;  %v110_v44 = vmul.f32 0.6931472, %v361_v38  ;;  %v158_v4 = vmul.f32 %v355_v11, %v157_v51  ;;  %v177_v5 = vand.u32 2147483647, %v556_v23 }
  0x46   :  { %v365_v47 = vpop.eup %364  ;;  %v119_v48 = vmul.f32 0.6931472, %v363_v43  ;;  %vm602_vm6 = vcmp.lt.f32.partialorder %v168_v55, 0.0004427343  ;;  %v167_v11 = vmul.f32 %v546_v15, %v166_v59  ;;  %v176_v25 = vmul.f32 %v556_v23, %v175_v0 }
  0x47   :  { %v116_v52 = vsel %vm552_vm0, %v113_v27, %v110_v44  ;;  %v128_v53 = vmul.f32 0.6931472, %v365_v47  ;;  %v367_v56 = vpop.eup %366  ;;  %vm178_vm7 = vcmp.lt.f32.partialorder %v177_v5, 0.0004427343 }
  0x48   :  { %v125_v57 = vsel %vm558_vm1, %v122_v34, %v119_v48  ;;  %v588_v61 = vadd.f32 %v116_v52, %v533_v60  ;;  %v137_v63 = vmul.f32 0.6931472, %v367_v56  ;;  %v369_v3 = vpop.eup %368 }
  0x49   :  { %v134_v62 = vsel %vm564_vm2, %v131_v39, %v128_v53  ;;  %v593_v2 = vadd.f32 %v125_v57, %v536_v1  ;;  %v146_v8 = vmul.f32 0.6931472, %v369_v3  ;;  %v371_v17 = vpop.eup %370  ;;  %v271_v39 = vshrl.u32 %v270_v35, 7 }
  0x4a   :  { %v597_v6 = vadd.f32 %v134_v62, %v538_v7  ;;  %v188_v10 = vsub.f32 0.0, %v588_v61  ;;  %v143_v60 = vsel %vm569_vm3, %v140_v49, %v137_v63  ;;  %v155_v24 = vmul.f32 0.6931472, %v371_v17 }
  0x4b   :  { %v189_v1 = vsub.f32 0.0, %v593_v2  ;;  %v609_v18 = vadd.f32 %v143_v60, %v540_v9  ;;  %v373_v21 = vpop.eup %372  ;;  %v152_v22 = vsel %vm574_vm4, %v149_v54, %v146_v8  ;;  %v281_v44 = vmul.u32 1024, %v271_v39 }
  0x4c   :  { %v190_v7 = vsub.f32 0.0, %v597_v6  ;;  %v196_v20 = vmul.f32 1.442695, %v188_v10  ;;  %v164_v27 = vmul.f32 0.6931472, %v373_v21  ;;  %v616_v28 = vadd.f32 %v152_v22, %v542_v12  ;;  %v375_v9 = vpop.eup %374 }
  0x4d   :  { %v198_v26 = vmul.f32 1.442695, %v189_v1  ;;  %v191_v15 = vsub.f32 0.0, %v609_v18  ;;  %v161_v29 = vsel %vm583_vm5, %v158_v4, %v155_v24  ;;  %v173_v32 = vmul.f32 0.6931472, %v375_v9 }
  0x4e   :  { %376 = vpow2.f32 %v196_v20  ;;  %v200_v30 = vmul.f32 1.442695, %v190_v7  ;;  %v170_v31 = vsel %vm602_vm6, %v167_v11, %v164_v27  ;;  %v624_v23 = vadd.f32 %v161_v29, %v544_v13 }
  0x4f   :  { %378 = vpow2.f32 %v198_v26  ;;  %v192_v12 = vsub.f32 0.0, %v616_v28  ;;  %v628_v33 = vadd.f32 %v170_v31, %v548_v16  ;;  %v202_v34 = vmul.f32 1.442695, %v191_v15 }
  0x50   :  { %380 = vpow2.f32 %v200_v30  ;;  %v179_v36 = vsel %vm178_vm7, %v176_v25, %v173_v32  ;;  %v193_v37 = vsub.f32 0.0, %v624_v23  ;;  %v273_v13 = vand.u32 127, %v270_v35 }
  0x51   :  { %v204_v38 = vmul.f32 1.442695, %v192_v12  ;;  %v633_v40 = vadd.f32 %v179_v36, %v550_v19  ;;  %v194_v41 = vsub.f32 0.0, %v628_v33  ;;  %382 = vpow2.f32 %v202_v34 }
  0x52   :  { %v206_v42 = vmul.f32 1.442695, %v193_v37  ;;  %v274_v46 = vadd.s32 128, %v273_v13  ;;  %v275_v48 = vadd.s32 256, %v273_v13  ;;  %v276_v49 = vadd.s32 384, %v273_v13 }
  0x53   :  { %384 = vpow2.f32 %v204_v38  ;;  %v195_v16 = vsub.f32 0.0, %v633_v40  ;;  %v208_v43 = vmul.f32 1.442695, %v194_v41  ;;  %v277_v51 = vadd.s32 512, %v273_v13 }
  0x54   :  { %386 = vpow2.f32 %v206_v42  ;;  %v278_v52 = vadd.s32 640, %v273_v13  ;;  %v282_v35 = vadd.s32 %v281_v44, %v273_v13  ;;  %v279_v56 = vadd.s32 768, %v273_v13 }
  0x55   :  { %388 = vpow2.f32 %v208_v43  ;;  %v210_v45 = vmul.f32 1.442695, %v195_v16  ;;  %v283_v57 = vadd.s32 %v281_v44, %v274_v46  ;;  %v280_v62 = vadd.s32 896, %v273_v13 }
  0x56   :  { %v284_v63 = vadd.s32 %v281_v44, %v275_v48  ;;  %v285_v4 = vadd.s32 %v281_v44, %v276_v49  ;;  %v286_v5 = vadd.s32 %v281_v44, %v277_v51  ;;  %v287_v10 = vadd.s32 %v281_v44, %v278_v52 }
  0x57   :  { %390 = vpow2.f32 %v210_v45  ;;  %vm290_vm8 = vcmp.lt.s32.totalorder %v282_v35, 2048  ;;  %v288_v7 = vadd.s32 %v281_v44, %v279_v56  ;;  %vm291_vm9 = vcmp.lt.s32.totalorder %v283_v57, 2048 }
  0x58   :  { %v377_v47 = vpop.eup %376  ;;  %vm292_vm10 = vcmp.lt.s32.totalorder %v284_v63, 2048  ;;  %vm293_vm11 = vcmp.lt.s32.totalorder %v285_v4, 2048  ;;  %vm294_vm12 = vcmp.lt.s32.totalorder %v286_v5, 2048  ;;  %v289_v13 = vadd.s32 %v281_v44, %v280_v62 }
  0x59   :  { %v379_v19 = vpop.eup %378  ;;  %v212_v50 = vsub.f32 1.0, %v377_v47  ;;  %vm295_vm13 = vcmp.lt.s32.totalorder %v287_v10, 2048  ;;  %vm296_vm14 = vcmp.lt.s32.totalorder %v288_v7, 2048 }
  0x5a   :  { %v213_v53 = vsub.f32 1.0, %v379_v19  ;;  %v381_v54 = vpop.eup %380  ;;  %vm297_vm15 = vcmp.lt.s32.totalorder %v289_v13, 2048 }
  0x5b   :  { %v220_v55 = vmul.f32 %v212_v50, %v212_v50  ;;  %v214_v58 = vsub.f32 1.0, %v381_v54  ;;  %v383_v0 = vpop.eup %382 }
  0x5c   :  { %v221_v59 = vmul.f32 %v213_v53, %v213_v53  ;;  %v215_v8 = vsub.f32 1.0, %v383_v0 }
  0x5d   :  { %v228_v3 = vmul.f32 0.5, %v220_v55  ;;  %v385_v60 = vpop.eup %384  ;;  %v222_v14 = vmul.f32 %v214_v58, %v214_v58 }
  0x5e   :  { %v229_v1 = vmul.f32 0.5, %v221_v59  ;;  %v216_v17 = vsub.f32 1.0, %v385_v60  ;;  %v387_v20 = vpop.eup %386  ;;  %v223_v21 = vmul.f32 %v215_v8, %v215_v8 }
  0x5f   :  { %v236_v11 = vmul.f32 %v228_v3, %v588_v61  ;;  %v230_v22 = vmul.f32 0.5, %v222_v14  ;;  %v389_v25 = vpop.eup %388  ;;  %v217_v26 = vsub.f32 1.0, %v387_v20 }
  0x60   :  { %v237_v24 = vmul.f32 %v229_v1, %v593_v2  ;;  %v224_v27 = vmul.f32 %v216_v17, %v216_v17  ;;  %v218_v9 = vsub.f32 1.0, %v389_v25  ;;  %v231_v29 = vmul.f32 0.5, %v223_v21 }
  0x61   :  { %v298_v15 = vsel %vm290_vm8, %v236_v11, 0.0  ;;  %v238_v30 = vmul.f32 %v230_v22, %v597_v6  ;;  %v391_v32 = vpop.eup %390  ;;  %v225_v61 = vmul.f32 %v217_v26, %v217_v26 }
  0x62   :  { %v299_v31 = vsel %vm291_vm9, %v237_v24, 0.0  ;;  %v232_v12 = vmul.f32 0.5, %v224_v27  ;;  %v219_v36 = vsub.f32 1.0, %v391_v32  ;;  %v226_v37 = vmul.f32 %v218_v9, %v218_v9 }
  0x63   :  { %v306_v34 = vadd.f32 %v299_v31, %v298_v15  ;;  %v239_v2 = vmul.f32 %v231_v29, %v609_v18  ;;  %v300_v38 = vsel %vm292_vm10, %v238_v30, 0.0  ;;  %v233_v39 = vmul.f32 0.5, %v225_v61 }
  0x64   :  { %v240_v41 = vmul.f32 %v232_v12, %v616_v28  ;;  %v227_v16 = vmul.f32 %v219_v36, %v219_v36  ;;  %v234_v43 = vmul.f32 0.5, %v226_v37 }
  0x65   :  { %v307_v42 = vadd.f32 %v306_v34, %v300_v38  ;;  %v301_v6 = vsel %vm293_vm11, %v239_v2, 0.0  ;;  %v241_v45 = vmul.f32 %v233_v39, %v624_v23 }
  0x66   :  { %v302_v46 = vsel %vm294_vm12, %v240_v41, 0.0  ;;  %v235_v48 = vmul.f32 0.5, %v227_v16  ;;  %v242_v18 = vmul.f32 %v234_v43, %v628_v33 }
  0x67   :  { %v308_v47 = vadd.f32 %v307_v42, %v301_v6  ;;  %v303_v49 = vsel %vm295_vm13, %v241_v45, 0.0 }
  0x68   :  { %v243_v28 = vmul.f32 %v235_v48, %v633_v40  ;;  %v304_v44 = vsel %vm296_vm14, %v242_v18, 0.0 }
  0x69   :  { %v309_v19 = vadd.f32 %v308_v47, %v302_v46 }
  0x6a   :  { %v305_v51 = vsel %vm297_vm15, %v243_v28, 0.0 }
  0x6b   :  { %v310_v50 = vadd.f32 %v309_v19, %v303_v49 }
  0x6d   :  { %v311_v52 = vadd.f32 %v310_v50, %v304_v44 }
  0x6f   :  { %v312_v53 = vadd.f32 %v311_v52, %v305_v51 }
  0x71   :  { %313 = vadd.xlane.f32.xlu0 %v312_v53 }
  0xfe   :  { %v314_v35 = vpop.xlane.xlu0 %313 }
  0xff   :  { %v315_v23 = vrot.slane %v314_v35, 4 }
 0x101   :  { %v316_v54 = vadd.f32 %v315_v23, %v314_v35 }
 0x103   :  { %v317_v55 = vrot.slane %v316_v54, 2 }
 0x105   :  { %v318_v56 = vadd.f32 %v317_v55, %v316_v54 }
 0x107   :  { %v319_v57 = vrot.slane %v318_v56, 1 }
 0x109   :  { %v320_v58 = vadd.f32 %v319_v57, %v318_v56 }
 0x10b   :  { %339 = vpush %v320_v58 }
 0x13c   :  { %s340_s1 = spop %339 }
 0x13d   :  { %323 = sst [smem:[#allocation7]] %s340_s1 }
 0x13e   :  { %445 = shalt.err (!%p442_p4)
}
 0x13f   :  { %s454_s11 = smov [#allocation7]  }
 0x140   :  { %331 = dma.smem_to_hbm %s454_s11, 16, %s663_s2, [#allocation4]  }
 0x141   :  { %450 = dma.done.wait [#allocation4], 16  }
 0x142   :  { %451 = vsyncadd [#allocation4], 4294967280 }
 0x143   :  { %335 = sfence }
 0x144   :  { %336 = vsyncpa [#allocation3], 1 }
 0x145   :  { %337 = vsyncpa [#allocation6], 1 }
 0x146   :  { %338 = vsyncpa [#allocation4], 1 }

</bundles_post_ra>
